<compile_context>
chip_gen: v5e
topology: v5e:2x2
jax: 0.10.0
libtpu: 0.0.40
codegen_flags: <defaults>
</compile_context>

<pallas_src>
import jax
import jax.numpy as jnp
from jax.experimental import pallas as pl
from jax.experimental.pallas import tpu as pltpu


def encoder_layer_dims(input_dim, output_dim, depth):
    """Replicates the layer-construction logic of the PyTorch Encoder.__init__.

    Returns a list of (in_features, out_features) per Linear layer, in order.
    """
    dims = []
    for i in range(depth):
        if input_dim // 2 ** (i + 1) > output_dim:
            dims.append((input_dim // 2 ** i, input_dim // 2 ** (i + 1)))
        else:
            # NOTE: the PyTorch code sets self.depth = i and breaks, but the final
            # layer below still uses the *constructor argument* `depth`.  Reproduced
            # faithfully (choose shapes in __main__ where the break does not occur).
            break
    dims.append((input_dim // 2 ** depth, output_dim))
    return dims


def _make_encoder_kernel(n_layers):
    """Kernel factory: ref order is (x, w_0..w_{n-1}, b_0..b_{n-1}, out)."""
    def kernel(x_ref, *refs):
        w_refs = refs[:n_layers]
        b_refs = refs[n_layers:2 * n_layers]
        out_ref = refs[2 * n_layers]

        h = x_ref[...].astype(jnp.float32)          # (bt, D0)
        # Chain of Linear layers, NO activations (matches Encoder.forward exactly).
        for k in range(n_layers):
            h = jnp.dot(h, w_refs[k][...], preferred_element_type=jnp.float32)
            h = h + b_refs[k][...]                  # (1, D_k) broadcast add
        out_ref[...] = h.astype(out_ref.dtype)
    return kernel


def encoder_forward(x, weights, biases):
    """x: (B, input_dim). weights[k]: torch layout (out_k, in_k). biases[k]: (out_k,)."""
    B, D0 = x.shape
    n_layers = len(weights)
    out_dim = weights[-1].shape[0]

    # --- plain-JAX parameter prep (layout glue only) ------------------------------
    w_k = [jnp.transpose(w, (1, 0)).astype(jnp.float32) for w in weights]   # (in, out)
    b_k = [b.reshape(1, -1).astype(jnp.float32) for b in biases]            # (1, out)

    # --- batch tiling: one "parallel" grid axis ------------------------------------
    if B >= 256 and B % 128 == 0:
        bt = 128                      # full sublane-multiple tiles for the MXU
    else:
        bt = B                        # tiny batch: single whole-array block
    grid = (B // bt,)

    x_spec = pl.BlockSpec((bt, D0), lambda i: (i, 0))
    w_specs = [pl.BlockSpec(w.shape, lambda i: (0, 0)) for w in w_k]
    b_specs = [pl.BlockSpec(b.shape, lambda i: (0, 0)) for b in b_k]
    out_spec = pl.BlockSpec((bt, out_dim), lambda i: (i, 0))

    return pl.pallas_call(
        _make_encoder_kernel(n_layers),
        out_shape=jax.ShapeDtypeStruct((B, out_dim), jnp.float32),
        grid=grid,
        in_specs=[x_spec] + w_specs + b_specs,
        out_specs=out_spec,
        compiler_params=pltpu.CompilerParams(
            dimension_semantics=("parallel",)),
    )(x.astype(jnp.float32), *w_k, *b_k)


def reference_forward(x, weights, biases):
    """Pure-JAX mirror of the PyTorch Encoder.forward, for verification."""
    hp = jax.lax.Precision.HIGHEST
    h = x.astype(jnp.float32)
    for w, b in zip(weights, biases):
        h = jnp.dot(h, w.T, precision=hp) + b
    return h


if __name__ == "__main__":
    # Encoder(input_dim=64, output_dim=4, depth=3)  ->  Linear chain 64->32->16->8->4
    input_dim, output_dim, depth = 64, 4, 3
    B = 2
    dims = encoder_layer_dims(input_dim, output_dim, depth)

    key = jax.random.PRNGKey(0)
    keys = jax.random.split(key, 2 * len(dims) + 1)

    def uinit(k, shape, fan_in):
        bound = float(fan_in) ** -0.5
        return jax.random.uniform(k, shape, jnp.float32, -bound, bound)

    weights, biases = [], []
    for li, (din, dout) in enumerate(dims):
        weights.append(uinit(keys[2 * li], (dout, din), din))   # torch (out, in) layout
        biases.append(uinit(keys[2 * li + 1], (dout,), din))

    x = jax.random.normal(keys[-1], (B, input_dim), jnp.float32)

    out = encoder_forward(x, weights, biases)
    jax.block_until_ready(out)

    ref = reference_forward(x, weights, biases)
    assert out.shape == (B, output_dim)
    assert jnp.allclose(out, ref, atol=5e-3, rtol=1e-2), (out, ref)

    print("KERNEL_OK")
</pallas_src>

<mosaic_0001>
module attributes {stable_mosaic.version = 11 : i64} {
  func.func @kernel(%arg0: i32, %arg1: memref<2x64xf32, #tpu.memory_space<vmem>>, %arg2: memref<64x32xf32, #tpu.memory_space<vmem>>, %arg3: memref<32x16xf32, #tpu.memory_space<vmem>>, %arg4: memref<16x8xf32, #tpu.memory_space<vmem>>, %arg5: memref<8x4xf32, #tpu.memory_space<vmem>>, %arg6: memref<1x32xf32, #tpu.memory_space<vmem>>, %arg7: memref<1x16xf32, #tpu.memory_space<vmem>>, %arg8: memref<1x8xf32, #tpu.memory_space<vmem>>, %arg9: memref<1x4xf32, #tpu.memory_space<vmem>>, %arg10: memref<2x4xf32, #tpu.memory_space<vmem>>) attributes {dimension_semantics = [#tpu.dimension_semantics<parallel>], iteration_bounds = array<i64: 1>, scalar_prefetch = 0 : i64, scratch_operands = 0 : i64, tpu.core_type = #tpu.core_type<tc>, window_params = [{transform_indices = @transform_0, window_bounds = array<i64: 2, 64>}, {pipeline_mode = #tpu.pipeline_mode<synchronous>, transform_indices = @transform_1, window_bounds = array<i64: 64, 32>}, {pipeline_mode = #tpu.pipeline_mode<synchronous>, transform_indices = @transform_2, window_bounds = array<i64: 32, 16>}, {pipeline_mode = #tpu.pipeline_mode<synchronous>, transform_indices = @transform_3, window_bounds = array<i64: 16, 8>}, {pipeline_mode = #tpu.pipeline_mode<synchronous>, transform_indices = @transform_4, window_bounds = array<i64: 8, 4>}, {pipeline_mode = #tpu.pipeline_mode<synchronous>, transform_indices = @transform_5, window_bounds = array<i64: 1, 32>}, {pipeline_mode = #tpu.pipeline_mode<synchronous>, transform_indices = @transform_6, window_bounds = array<i64: 1, 16>}, {pipeline_mode = #tpu.pipeline_mode<synchronous>, transform_indices = @transform_7, window_bounds = array<i64: 1, 8>}, {pipeline_mode = #tpu.pipeline_mode<synchronous>, transform_indices = @transform_8, window_bounds = array<i64: 1, 4>}, {transform_indices = @transform_9, window_bounds = array<i64: 2, 4>}]} {
    %c0 = arith.constant 0 : index
    %c0_0 = arith.constant 0 : index
    %0 = vector.load %arg1[%c0, %c0_0] : memref<2x64xf32, #tpu.memory_space<vmem>>, vector<2x64xf32>
    %c0_1 = arith.constant 0 : index
    %c0_2 = arith.constant 0 : index
    %1 = vector.load %arg2[%c0_1, %c0_2] : memref<64x32xf32, #tpu.memory_space<vmem>>, vector<64x32xf32>
    %cst = arith.constant dense<0.000000e+00> : vector<2x32xf32>
    %2 = tpu.matmul %0, %1, %cst {dimension_numbers = #tpu.dot_dimension_numbers<[1], [0], [0], [1], [0, 0, 1, 1], [], []>} : vector<2x64xf32>, vector<64x32xf32>, vector<2x32xf32> -> vector<2x32xf32>
    %c0_3 = arith.constant 0 : index
    %c0_4 = arith.constant 0 : index
    %3 = vector.load %arg6[%c0_3, %c0_4] : memref<1x32xf32, #tpu.memory_space<vmem>>, vector<1x32xf32>
    %4 = vector.broadcast %3 : vector<1x32xf32> to vector<2x32xf32>
    %5 = arith.addf %2, %4 : vector<2x32xf32>
    %c0_5 = arith.constant 0 : index
    %c0_6 = arith.constant 0 : index
    %6 = vector.load %arg3[%c0_5, %c0_6] : memref<32x16xf32, #tpu.memory_space<vmem>>, vector<32x16xf32>
    %cst_7 = arith.constant dense<0.000000e+00> : vector<2x16xf32>
    %7 = tpu.matmul %5, %6, %cst_7 {dimension_numbers = #tpu.dot_dimension_numbers<[1], [0], [0], [1], [0, 0, 1, 1], [], []>} : vector<2x32xf32>, vector<32x16xf32>, vector<2x16xf32> -> vector<2x16xf32>
    %c0_8 = arith.constant 0 : index
    %c0_9 = arith.constant 0 : index
    %8 = vector.load %arg7[%c0_8, %c0_9] : memref<1x16xf32, #tpu.memory_space<vmem>>, vector<1x16xf32>
    %9 = vector.broadcast %8 : vector<1x16xf32> to vector<2x16xf32>
    %10 = arith.addf %7, %9 : vector<2x16xf32>
    %c0_10 = arith.constant 0 : index
    %c0_11 = arith.constant 0 : index
    %11 = vector.load %arg4[%c0_10, %c0_11] : memref<16x8xf32, #tpu.memory_space<vmem>>, vector<16x8xf32>
    %cst_12 = arith.constant dense<0.000000e+00> : vector<2x8xf32>
    %12 = tpu.matmul %10, %11, %cst_12 {dimension_numbers = #tpu.dot_dimension_numbers<[1], [0], [0], [1], [0, 0, 1, 1], [], []>} : vector<2x16xf32>, vector<16x8xf32>, vector<2x8xf32> -> vector<2x8xf32>
    %c0_13 = arith.constant 0 : index
    %c0_14 = arith.constant 0 : index
    %13 = vector.load %arg8[%c0_13, %c0_14] : memref<1x8xf32, #tpu.memory_space<vmem>>, vector<1x8xf32>
    %14 = vector.broadcast %13 : vector<1x8xf32> to vector<2x8xf32>
    %15 = arith.addf %12, %14 : vector<2x8xf32>
    %c0_15 = arith.constant 0 : index
    %c0_16 = arith.constant 0 : index
    %16 = vector.load %arg5[%c0_15, %c0_16] : memref<8x4xf32, #tpu.memory_space<vmem>>, vector<8x4xf32>
    %cst_17 = arith.constant dense<0.000000e+00> : vector<2x4xf32>
    %17 = tpu.matmul %15, %16, %cst_17 {dimension_numbers = #tpu.dot_dimension_numbers<[1], [0], [0], [1], [0, 0, 1, 1], [], []>} : vector<2x8xf32>, vector<8x4xf32>, vector<2x4xf32> -> vector<2x4xf32>
    %c0_18 = arith.constant 0 : index
    %c0_19 = arith.constant 0 : index
    %18 = vector.load %arg9[%c0_18, %c0_19] : memref<1x4xf32, #tpu.memory_space<vmem>>, vector<1x4xf32>
    %19 = vector.broadcast %18 : vector<1x4xf32> to vector<2x4xf32>
    %20 = arith.addf %17, %19 : vector<2x4xf32>
    %c0_20 = arith.constant 0 : index
    %c0_21 = arith.constant 0 : index
    %21 = vector.load %arg10[%c0_20, %c0_21] : memref<2x4xf32, #tpu.memory_space<vmem>>, vector<2x4xf32>
    tpu.vector_store %arg10[%c0_20, %c0_21], %20 {strides = array<i32>} : memref<2x4xf32, #tpu.memory_space<vmem>>, vector<2x4xf32>,
    return
  }
  func.func @transform_0(%arg0: i32) -> (i32, i32) {
    %c0_i32 = arith.constant 0 : i32
    %c0_i32_0 = arith.constant 0 : i32
    return %arg0, %c0_i32 : i32, i32
  }
  func.func @transform_1(%arg0: i32) -> (i32, i32) {
    %c0_i32 = arith.constant 0 : i32
    %c0_i32_0 = arith.constant 0 : i32
    %c0_i32_1 = arith.constant 0 : i32
    return %c0_i32, %c0_i32_0 : i32, i32
  }
  func.func @transform_2(%arg0: i32) -> (i32, i32) {
    %c0_i32 = arith.constant 0 : i32
    %c0_i32_0 = arith.constant 0 : i32
    %c0_i32_1 = arith.constant 0 : i32
    return %c0_i32, %c0_i32_0 : i32, i32
  }
  func.func @transform_3(%arg0: i32) -> (i32, i32) {
    %c0_i32 = arith.constant 0 : i32
    %c0_i32_0 = arith.constant 0 : i32
    %c0_i32_1 = arith.constant 0 : i32
    return %c0_i32, %c0_i32_0 : i32, i32
  }
  func.func @transform_4(%arg0: i32) -> (i32, i32) {
    %c0_i32 = arith.constant 0 : i32
    %c0_i32_0 = arith.constant 0 : i32
    %c0_i32_1 = arith.constant 0 : i32
    return %c0_i32, %c0_i32_0 : i32, i32
  }
  func.func @transform_5(%arg0: i32) -> (i32, i32) {
    %c0_i32 = arith.constant 0 : i32
    %c0_i32_0 = arith.constant 0 : i32
    %c0_i32_1 = arith.constant 0 : i32
    return %c0_i32, %c0_i32_0 : i32, i32
  }
  func.func @transform_6(%arg0: i32) -> (i32, i32) {
    %c0_i32 = arith.constant 0 : i32
    %c0_i32_0 = arith.constant 0 : i32
    %c0_i32_1 = arith.constant 0 : i32
    return %c0_i32, %c0_i32_0 : i32, i32
  }
  func.func @transform_7(%arg0: i32) -> (i32, i32) {
    %c0_i32 = arith.constant 0 : i32
    %c0_i32_0 = arith.constant 0 : i32
    %c0_i32_1 = arith.constant 0 : i32
    return %c0_i32, %c0_i32_0 : i32, i32
  }
  func.func @transform_8(%arg0: i32) -> (i32, i32) {
    %c0_i32 = arith.constant 0 : i32
    %c0_i32_0 = arith.constant 0 : i32
    %c0_i32_1 = arith.constant 0 : i32
    return %c0_i32, %c0_i32_0 : i32, i32
  }
  func.func @transform_9(%arg0: i32) -> (i32, i32) {
    %c0_i32 = arith.constant 0 : i32
    %c0_i32_0 = arith.constant 0 : i32
    return %arg0, %c0_i32 : i32, i32
  }
}

</mosaic_0001>

<bundles_post_ra>
// kernel: tpu_custom_call.1
= control target key start
LH: loop header
LB: loop body
LE: loop exit
PB: predicated region body
PF: predicated region fallthrough
CT: control target
= control target key end

     0   :  { %s328_s0 = inlined_call_operand.vmem [shape: f32[2,64], index: 0, kind: input, shape index: {}]   ;;  %s329_s1 = inlined_call_operand.vmem [shape: f32[64,32], index: 1, kind: input, shape index: {}]   ;;  %s330_s2 = inlined_call_operand.vmem [shape: f32[32,16], index: 2, kind: input, shape index: {}]   ;;  %s331_s3 = inlined_call_operand.vmem [shape: f32[16,8], index: 3, kind: input, shape index: {}]   ;;  %s332_s4 = inlined_call_operand.vmem [shape: f32[8,4], index: 4, kind: input, shape index: {}]   ;;  %s333_s5 = inlined_call_operand.vmem [shape: f32[1,32], index: 5, kind: input, shape index: {}]   ;;  %s334_s6 = inlined_call_operand.vmem [shape: f32[1,16], index: 6, kind: input, shape index: {}]   ;;  %s335_s7 = inlined_call_operand.vmem [shape: f32[1,8], index: 7, kind: input, shape index: {}]   ;;  %s336_s8 = inlined_call_operand.vmem [shape: f32[1,4], index: 8, kind: input, shape index: {}]   ;;  %s337_s9 = inlined_call_operand.hbm [shape: f32[2,4], index: 9, kind: output, shape index: {}]  }
   0x1   :  { %v41_v0 = vld [vmem:[%s329_s1 + $0x38] sm:$0xff]  ;;  %v40_v1 = vld [vmem:[%s329_s1 + $0x30] sm:$0xff]  ;;  %v39_v2 = vld [vmem:[%s329_s1 + $0x28] sm:$0xff] }
   0x2   :  { %58 = vmatpush.msra.mxu0 %v41_v0  ;;  %v73_v3 = vld [vmem:[%s330_s2 + $0x18] sm:$0xff]  ;;  %v72_v4 = vld [vmem:[%s330_s2 + $0x10] sm:$0xff]  ;;  %v38_v5 = vld [vmem:[%s329_s1 + $0x20] sm:$0xff] }
   0x3   :  { %94 = vmatpush.msra.mxu1 %v73_v3 }
   0x4   :  { %59 = vmatpush.msra.mxu0 %v40_v1 }
   0x6   :  { %60 = vmatpush.msra.mxu0 %v39_v2 }
   0x7   :  { %14 = vsyncpa [#allocation3], 0  ;;  %v37_v6 = vld [vmem:[%s329_s1 + $0x18] sm:$0xff]  ;;  %95 = vmatpush.msra.mxu1 %v72_v4  ;;  %v36_v7 = vld [vmem:[%s329_s1 + $0x10] sm:$0xff]  ;;  %vm46_vm0 = vcmask 523264   ;;  %vm78_vm1 = vcmask 261120  }
   0x8   :  { %61 = vmatpush.msra.mxu0 %v38_v5  ;;  %v35_v8 = vld [vmem:[%s329_s1 + $0x8] sm:$0xff]  ;;  %v34_v9 = vld [vmem:[%s329_s1] sm:$0xff]  ;;  %vm108_vm2 = vcmask 130048   ;;  %vm137_vm3 = vcmask 64512   ;;  %s170_s26 = sshll.u32 %s337_s9, 4  ;;  %vm161_vm4 = vcmask 25600   ;;  %s171_s26 = int_to_ptr.hbm [resolvable:$true] %s170_s26 }
   0x9   :  { %v33_v10 = vld [vmem:[%s328_s0] sm:$0x3]  ;;  %v71_v11 = vld [vmem:[%s330_s2 + $0x8] sm:$0xff] }
   0xa   :  { %62 = vmatpush.msra.mxu0 %v37_v6  ;;  %96 = vmatpush.msra.mxu1 %v71_v11  ;;  %v70_v12 = vld [vmem:[%s330_s2] sm:$0xff]  ;;  %v103_v16 = vld [vmem:[%s331_s3 + $0x8] sm:$0xff] }
   0xb   :  { %v184_v13 = vld [vmem:[%s333_s5] ss:$0 sm:$0xff]  ;;  %126 = vmatpush.msra.mxu2 %v103_v16 }
   0xc   :  { %63 = vmatpush.msra.mxu0 %v36_v7  ;;  %97 = vmatpush.msra.mxu1 %v70_v12  ;;  %v102_v17 = vld [vmem:[%s331_s3] sm:$0xff] }
   0xd   :  { %127 = vmatpush.msra.mxu2 %v102_v17  ;;  %v185_v18 = vld [vmem:[%s334_s6] ss:$0 sm:$0xff]  ;;  %s214_s6 = smov [#allocation2]  }
   0xe   :  { %64 = vmatpush.msra.mxu0 %v35_v8  ;;  %v132_v21 = vld [vmem:[%s332_s4] sm:$0xff]  ;;  %s168_s23 = sshll.u32 %s214_s6, 4  ;;  %s169_s23 = int_to_ptr.vmem [resolvable:$true] %s168_s23 }
   0xf   :  { %156 = vmatpush.msra.mxu3 %v132_v21  ;;  %v186_v22 = vld [vmem:[%s335_s7] ss:$0 sm:$0xff] }
  0x10   :  { %65 = vmatpush.msra.mxu0 %v34_v9  ;;  %v187_v25 = vld [vmem:[%s336_s8] ss:$0 sm:$0xff] }
  0x11   :  { %179 = vmatmul.msk.f32.vlgmr.msra.gmra.mxu0 %vm46_vm0, %v33_v10 }
  0x8e   :  { %v67_v14 = vpop.f32.mrf.mxu0 }
  0x8f   :  { %v68_v15 = vadd.f32 %v184_v13, %v67_v14 }
  0x91   :  { %180 = vmatmul.msk.f32.vlgmr.msra.gmra.mxu1 %vm78_vm1, %v68_v15 }
 0x10e   :  { %v99_v19 = vpop.f32.mrf.mxu1 }
 0x10f   :  { %v100_v20 = vadd.f32 %v185_v18, %v99_v19 }
 0x111   :  { %181 = vmatmul.msk.f32.vlgmr.msra.gmra.mxu2 %vm108_vm2, %v100_v20 }
 0x194   :  { %v129_v23 = vpop.f32.mrf.mxu2 }
 0x195   :  { %v130_v24 = vadd.f32 %v186_v22, %v129_v23 }
 0x197   :  { %182 = vmatmul.msk.f32.vlgmr.msra.gmra.mxu3 %vm137_vm3, %v130_v24 }
 0x21a   :  { %v158_v26 = vpop.f32.mrf.mxu3 }
 0x21b   :  { %v159_v27 = vadd.f32 %v187_v25, %v158_v26 }
 0x21d   :  { %162 = vst.msk [vmem:[#allocation2] sm:$0x3] %vm161_vm4, %v159_v27 }
 0x21e   :  { %173 = dma.vmem_to_hbm [thread:$0]  %s169_s23, 32, %s171_s26, [#allocation3]  }
 0x21f   :  { %212 = dma.done.wait [#allocation3], 32  }
 0x220   :  { %213 = vsyncadd [#allocation3], 4294967264 }
 0x221   :  { %178 = vsyncpa [#allocation3], 1 }

</bundles_post_ra>
